<compile_context>
chip_gen: v7x
topology: tpu7x:2x2x1
jax: 0.10.0
libtpu: 0.0.40
codegen_flags: <defaults>
</compile_context>

<pallas_src>
import functools

import jax
import jax.numpy as jnp
from jax.experimental import pallas as pl
from jax.experimental.pallas import tpu as pltpu


# ----------------------------------------------------------------------------
# Fused Pallas kernel: GCN1 -> GCN2 -> head -> softmax, one batch per grid step
# ----------------------------------------------------------------------------
def _fused_actor_kernel(
    node_ref, edge_ref, nadj_ref, eadj_ref, dv_ref, de_ref, t_ref,
    # gcn1 params
    wv1_ref, bv1_ref, pe1_ref, we1_ref, be1_ref, pv1_ref,
    # gcn2 params
    wv2_ref, bv2_ref, pe2_ref, we2_ref, be2_ref, pv2_ref,
    # head params
    w1_ref, b1_ref, w2_ref, b2_ref,
    out_ref):
    f32 = jnp.float32
    mm = functools.partial(jnp.dot, preferred_element_type=f32)

    n0 = node_ref[0].astype(f32)     # [N, Fvi]
    e0 = edge_ref[0].astype(f32)     # [E, Fei]
    Av = nadj_ref[0].astype(f32)     # [N, N]
    Ae = eadj_ref[0].astype(f32)     # [E, E]
    dv = dv_ref[0].astype(f32)       # [N, 1]  (diag of D_v as a column)
    de = de_ref[0].astype(f32)       # [E, 1]  (diag of D_e as a column)
    T = t_ref[0].astype(f32)         # [N, E]
    Tt = T.T                         # [E, N]  single tiny transpose, reused by both layers

    def censnet(n_in, e_in, Wv, bv, pe_row, We, be, pv_row, need_edge):
        # ---- node update:
        #   relu( D_v (Av ∘ T diag(e·p_e) T^T) D_v (n @ Wv) + bv )
        # Diagonal D folded in as row/column scaling:
        #   (D M D) x = d * (M @ (d * x))
        g = jnp.sum(e_in * pe_row, axis=-1, keepdims=True)       # [E,1]  VPU+XLU (no MXU)
        Mv = mm(T, g * Tt)                                       # [N,N]
        n_lin = mm(n_in, Wv)                                     # [N,Fvo]
        n_new = jnp.maximum(dv * mm(Av * Mv, dv * n_lin) + bv, 0.0)
        if not need_edge:
            return n_new, None
        # ---- edge update:
        #   relu( D_e (Ae ∘ T^T diag(n'·p_v) T) D_e (e @ We) + be )
        h = jnp.sum(n_new * pv_row, axis=-1, keepdims=True)      # [N,1]
        Me = mm(Tt, h * T)                                       # [E,E]
        e_lin = mm(e_in, We)                                     # [E,Feo]
        e_new = jnp.maximum(de * mm(Ae * Me, de * e_lin) + be, 0.0)
        return n_new, e_new

    n1, e1 = censnet(n0, e0, wv1_ref[...], bv1_ref[...], pe1_ref[...],
                     we1_ref[...], be1_ref[...], pv1_ref[...], need_edge=True)
    # GCN2 edge output is never consumed by the head -> skip its computation.
    n2, _ = censnet(n1, e1, wv2_ref[...], bv2_ref[...], pe2_ref[...],
                    we2_ref[...], be2_ref[...], pv2_ref[...], need_edge=False)

    # ---- head: predict_v1 -> relu -> predict_v2 (VPU) -> softmax over nodes
    hdn = jnp.maximum(mm(n2, w1_ref[...]) + b1_ref[...], 0.0)    # [N, F]
    logits = jnp.sum(hdn * w2_ref[...], axis=-1, keepdims=True) + b2_ref[...]  # [N,1]
    m = jnp.max(logits, axis=0, keepdims=True)
    p = jnp.exp(logits - m)
    s = jnp.sum(p, axis=0, keepdims=True)
    out_ref[0] = (p / s).astype(out_ref.dtype)                   # [N, 1]


# ----------------------------------------------------------------------------
# Wrapper (glue: BlockSpecs / grid setup)
# ----------------------------------------------------------------------------
def _full_spec(arr):
    """Un-batched parameter: same full block every grid step."""
    zeros = (0,) * arr.ndim
    return pl.BlockSpec(arr.shape, lambda b, _z=zeros: _z)


def _batch_spec(arr):
    """Batched tensor: one batch element per grid step."""
    zeros = (0,) * (arr.ndim - 1)
    return pl.BlockSpec((1,) + arr.shape[1:], lambda b, _z=zeros: (b,) + _z)


@functools.partial(jax.jit, static_argnames=("remove_index",))
def actor_network_gcn_forward(params, node, edge, node_adj, edge_adj, D_v, D_e,
                              T, remove_index=False):
    B, N, _ = node.shape
    _, E, _ = edge.shape

    # TODO(synk): D_v / D_e are assumed diagonal (standard CensNet D^{-1/2});
    # only their diagonals are used inside the kernel.
    dv = jnp.diagonal(D_v, axis1=1, axis2=2)[..., None]   # [B, N, 1]
    de = jnp.diagonal(D_e, axis1=1, axis2=2)[..., None]   # [B, E, 1]

    g1, g2, hd = params["gcn1"], params["gcn2"], params["head"]
    batched = [node, edge, node_adj, edge_adj, dv, de, T]
    weights = [
        g1["W_v"], g1["b_v"], g1["p_e"].T, g1["W_e"], g1["b_e"], g1["p_v"].T,
        g2["W_v"], g2["b_v"], g2["p_e"].T, g2["W_e"], g2["b_e"], g2["p_v"].T,
        hd["W1"], hd["b1"], hd["W2"].T, hd["b2"],
    ]

    probs = pl.pallas_call(
        _fused_actor_kernel,
        out_shape=jax.ShapeDtypeStruct((B, N, 1), jnp.float32),
        grid=(B,),
        in_specs=[_batch_spec(a) for a in batched] + [_full_spec(w) for w in weights],
        out_specs=pl.BlockSpec((1, N, 1), lambda b: (b, 0, 0)),
        compiler_params=pltpu.CompilerParams(
            dimension_semantics=("parallel",)),
    )(*batched, *weights)

    probs = probs.reshape(B, N)   # matches node.reshape((-1, node.size(1)))

    if remove_index is not False:
        # Drop the column and renormalize: exactly equivalent to removing the
        # logit before softmax (p_j / sum_{k != i} p_k).
        kept = jnp.concatenate(
            [probs[:, :remove_index], probs[:, remove_index + 1:]], axis=1)
        probs = kept / jnp.sum(kept, axis=-1, keepdims=True)
    return probs


# ----------------------------------------------------------------------------
# Deterministic parameter init
# ----------------------------------------------------------------------------
def init_params(key, fv_in, fe_in, fv_out, fe_out):
    def lin(key, fin, fout, scale=0.1):
        kw, kb = jax.random.split(key)
        return (scale * jax.random.normal(kw, (fin, fout), jnp.float32),
                scale * jax.random.normal(kb, (1, fout), jnp.float32))

    keys = jax.random.split(key, 12)

    def censnet_params(ks, fvi, fei, fvo, feo):
        W_v, b_v = lin(ks[0], fvi, fvo)
        W_e, b_e = lin(ks[1], fei, feo)
        p_e = 0.1 * jax.random.normal(ks[2], (fei, 1), jnp.float32)
        p_v = 0.1 * jax.random.normal(ks[3], (fvo, 1), jnp.float32)
        return dict(W_v=W_v, b_v=b_v, W_e=W_e, b_e=b_e, p_e=p_e, p_v=p_v)

    gcn1 = censnet_params(keys[0:4], fv_in, fe_in, fv_out, fe_out)
    gcn2 = censnet_params(keys[4:8], fv_out, fe_out, fv_out, fe_out)
    W1, b1 = lin(keys[8], fv_out, fv_out)
    W2, b2 = lin(keys[9], fv_out, 1)
    head = dict(W1=W1, b1=b1, W2=W2, b2=b2)
    return dict(gcn1=gcn1, gcn2=gcn2, head=head)


# ----------------------------------------------------------------------------
# Main
# ----------------------------------------------------------------------------
if __name__ == "__main__":
    B, N, E = 2, 8, 16
    FV_IN, FE_IN, FV_OUT, FE_OUT = 4, 4, 32, 32

    key = jax.random.PRNGKey(0)
    kp, kn, ke, ka, kb_, kt = jax.random.split(key, 6)

    params = init_params(kp, FV_IN, FE_IN, FV_OUT, FE_OUT)

    node = jax.random.normal(kn, (B, N, FV_IN), jnp.float32)
    edge = jax.random.normal(ke, (B, E, FE_IN), jnp.float32)

    # Synthetic (dense) graph structure tensors.
    node_adj = jnp.abs(jax.random.normal(ka, (B, N, N), jnp.float32))
    node_adj = 0.5 * (node_adj + jnp.swapaxes(node_adj, 1, 2)) + jnp.eye(N)
    edge_adj = jnp.abs(jax.random.normal(kb_, (B, E, E), jnp.float32))
    edge_adj = 0.5 * (edge_adj + jnp.swapaxes(edge_adj, 1, 2)) + jnp.eye(E)
    T = (jax.random.uniform(kt, (B, N, E)) > 0.5).astype(jnp.float32)

    def inv_sqrt_degree(adj):
        deg = jnp.sum(adj, axis=-1)
        d = 1.0 / jnp.sqrt(jnp.maximum(deg, 1e-6))
        return jax.vmap(jnp.diag)(d)

    D_v = inv_sqrt_degree(node_adj)   # [B, N, N]
    D_e = inv_sqrt_degree(edge_adj)   # [B, E, E]

    probs = actor_network_gcn_forward(params, node, edge, node_adj, edge_adj,
                                      D_v, D_e, T, remove_index=False)
    probs = jax.block_until_ready(probs)

    assert probs.shape == (B, N)
    assert bool(jnp.all(jnp.isfinite(probs)))
    assert bool(jnp.allclose(jnp.sum(probs, axis=-1), 1.0, atol=1e-5))
    print("KERNEL_OK")
</pallas_src>

<mosaic_0001>
module attributes {stable_mosaic.version = 11 : i64} {
  func.func @_fused_actor_kernel(%arg0: i32, %arg1: memref<1x8x4xf32, #tpu.memory_space<vmem>>, %arg2: memref<1x16x4xf32, #tpu.memory_space<vmem>>, %arg3: memref<1x8x8xf32, #tpu.memory_space<vmem>>, %arg4: memref<1x16x16xf32, #tpu.memory_space<vmem>>, %arg5: memref<1x8x1xf32, #tpu.memory_space<vmem>>, %arg6: memref<1x16x1xf32, #tpu.memory_space<vmem>>, %arg7: memref<1x8x16xf32, #tpu.memory_space<vmem>>, %arg8: memref<4x32xf32, #tpu.memory_space<vmem>>, %arg9: memref<1x32xf32, #tpu.memory_space<vmem>>, %arg10: memref<1x4xf32, #tpu.memory_space<vmem>>, %arg11: memref<4x32xf32, #tpu.memory_space<vmem>>, %arg12: memref<1x32xf32, #tpu.memory_space<vmem>>, %arg13: memref<1x32xf32, #tpu.memory_space<vmem>>, %arg14: memref<32x32xf32, #tpu.memory_space<vmem>>, %arg15: memref<1x32xf32, #tpu.memory_space<vmem>>, %arg16: memref<1x32xf32, #tpu.memory_space<vmem>>, %arg17: memref<32x32xf32, #tpu.memory_space<vmem>>, %arg18: memref<1x32xf32, #tpu.memory_space<vmem>>, %arg19: memref<1x32xf32, #tpu.memory_space<vmem>>, %arg20: memref<32x32xf32, #tpu.memory_space<vmem>>, %arg21: memref<1x32xf32, #tpu.memory_space<vmem>>, %arg22: memref<1x32xf32, #tpu.memory_space<vmem>>, %arg23: memref<1x1xf32, #tpu.memory_space<vmem>>, %arg24: memref<1x8x1xf32, #tpu.memory_space<vmem>>) attributes {dimension_semantics = [#tpu.dimension_semantics<parallel>], iteration_bounds = array<i64: 2>, scalar_prefetch = 0 : i64, scratch_operands = 0 : i64, tpu.core_type = #tpu.core_type<tc>, window_params = [{transform_indices = @transform_0, window_bounds = array<i64: 1, 8, 4>}, {transform_indices = @transform_1, window_bounds = array<i64: 1, 16, 4>}, {transform_indices = @transform_2, window_bounds = array<i64: 1, 8, 8>}, {transform_indices = @transform_3, window_bounds = array<i64: 1, 16, 16>}, {transform_indices = @transform_4, window_bounds = array<i64: 1, 8, 1>}, {transform_indices = @transform_5, window_bounds = array<i64: 1, 16, 1>}, {transform_indices = @transform_6, window_bounds = array<i64: 1, 8, 16>}, {pipeline_mode = #tpu.pipeline_mode<synchronous>, transform_indices = @transform_7, window_bounds = array<i64: 4, 32>}, {pipeline_mode = #tpu.pipeline_mode<synchronous>, transform_indices = @transform_8, window_bounds = array<i64: 1, 32>}, {pipeline_mode = #tpu.pipeline_mode<synchronous>, transform_indices = @transform_9, window_bounds = array<i64: 1, 4>}, {pipeline_mode = #tpu.pipeline_mode<synchronous>, transform_indices = @transform_10, window_bounds = array<i64: 4, 32>}, {pipeline_mode = #tpu.pipeline_mode<synchronous>, transform_indices = @transform_11, window_bounds = array<i64: 1, 32>}, {pipeline_mode = #tpu.pipeline_mode<synchronous>, transform_indices = @transform_12, window_bounds = array<i64: 1, 32>}, {pipeline_mode = #tpu.pipeline_mode<synchronous>, transform_indices = @transform_13, window_bounds = array<i64: 32, 32>}, {pipeline_mode = #tpu.pipeline_mode<synchronous>, transform_indices = @transform_14, window_bounds = array<i64: 1, 32>}, {pipeline_mode = #tpu.pipeline_mode<synchronous>, transform_indices = @transform_15, window_bounds = array<i64: 1, 32>}, {pipeline_mode = #tpu.pipeline_mode<synchronous>, transform_indices = @transform_16, window_bounds = array<i64: 32, 32>}, {pipeline_mode = #tpu.pipeline_mode<synchronous>, transform_indices = @transform_17, window_bounds = array<i64: 1, 32>}, {pipeline_mode = #tpu.pipeline_mode<synchronous>, transform_indices = @transform_18, window_bounds = array<i64: 1, 32>}, {pipeline_mode = #tpu.pipeline_mode<synchronous>, transform_indices = @transform_19, window_bounds = array<i64: 32, 32>}, {pipeline_mode = #tpu.pipeline_mode<synchronous>, transform_indices = @transform_20, window_bounds = array<i64: 1, 32>}, {pipeline_mode = #tpu.pipeline_mode<synchronous>, transform_indices = @transform_21, window_bounds = array<i64: 1, 32>}, {pipeline_mode = #tpu.pipeline_mode<synchronous>, transform_indices = @transform_22, window_bounds = array<i64: 1, 1>}, {transform_indices = @transform_23, window_bounds = array<i64: 1, 8, 1>}]} {
    %c0 = arith.constant 0 : index
    %c0_0 = arith.constant 0 : index
    %c0_1 = arith.constant 0 : index
    %0 = vector.load %arg1[%c0, %c0_0, %c0_1] : memref<1x8x4xf32, #tpu.memory_space<vmem>>, vector<1x8x4xf32>
    %1 = vector.shape_cast %0 : vector<1x8x4xf32> to vector<8x4xf32>
    %c0_2 = arith.constant 0 : index
    %c0_3 = arith.constant 0 : index
    %c0_4 = arith.constant 0 : index
    %2 = vector.load %arg2[%c0_2, %c0_3, %c0_4] : memref<1x16x4xf32, #tpu.memory_space<vmem>>, vector<1x16x4xf32>
    %3 = vector.shape_cast %2 : vector<1x16x4xf32> to vector<16x4xf32>
    %c0_5 = arith.constant 0 : index
    %c0_6 = arith.constant 0 : index
    %c0_7 = arith.constant 0 : index
    %4 = vector.load %arg3[%c0_5, %c0_6, %c0_7] : memref<1x8x8xf32, #tpu.memory_space<vmem>>, vector<1x8x8xf32>
    %5 = vector.shape_cast %4 : vector<1x8x8xf32> to vector<8x8xf32>
    %c0_8 = arith.constant 0 : index
    %c0_9 = arith.constant 0 : index
    %c0_10 = arith.constant 0 : index
    %6 = vector.load %arg4[%c0_8, %c0_9, %c0_10] : memref<1x16x16xf32, #tpu.memory_space<vmem>>, vector<1x16x16xf32>
    %7 = vector.shape_cast %6 : vector<1x16x16xf32> to vector<16x16xf32>
    %c0_11 = arith.constant 0 : index
    %c0_12 = arith.constant 0 : index
    %c0_13 = arith.constant 0 : index
    %8 = vector.load %arg5[%c0_11, %c0_12, %c0_13] : memref<1x8x1xf32, #tpu.memory_space<vmem>>, vector<1x8x1xf32>
    %9 = vector.shape_cast %8 : vector<1x8x1xf32> to vector<8x1xf32>
    %c0_14 = arith.constant 0 : index
    %c0_15 = arith.constant 0 : index
    %c0_16 = arith.constant 0 : index
    %10 = vector.load %arg6[%c0_14, %c0_15, %c0_16] : memref<1x16x1xf32, #tpu.memory_space<vmem>>, vector<1x16x1xf32>
    %11 = vector.shape_cast %10 : vector<1x16x1xf32> to vector<16x1xf32>
    %c0_17 = arith.constant 0 : index
    %c0_18 = arith.constant 0 : index
    %c0_19 = arith.constant 0 : index
    %12 = vector.load %arg7[%c0_17, %c0_18, %c0_19] : memref<1x8x16xf32, #tpu.memory_space<vmem>>, vector<1x8x16xf32>
    %13 = vector.shape_cast %12 : vector<1x8x16xf32> to vector<8x16xf32>
    %14 = tpu.transpose %13, [1, 0] : vector<8x16xf32> -> vector<16x8xf32>
    %c0_20 = arith.constant 0 : index
    %c0_21 = arith.constant 0 : index
    %15 = vector.load %arg8[%c0_20, %c0_21] : memref<4x32xf32, #tpu.memory_space<vmem>>, vector<4x32xf32>
    %c0_22 = arith.constant 0 : index
    %c0_23 = arith.constant 0 : index
    %16 = vector.load %arg9[%c0_22, %c0_23] : memref<1x32xf32, #tpu.memory_space<vmem>>, vector<1x32xf32>
    %c0_24 = arith.constant 0 : index
    %c0_25 = arith.constant 0 : index
    %17 = vector.load %arg10[%c0_24, %c0_25] : memref<1x4xf32, #tpu.memory_space<vmem>>, vector<1x4xf32>
    %c0_26 = arith.constant 0 : index
    %c0_27 = arith.constant 0 : index
    %18 = vector.load %arg11[%c0_26, %c0_27] : memref<4x32xf32, #tpu.memory_space<vmem>>, vector<4x32xf32>
    %c0_28 = arith.constant 0 : index
    %c0_29 = arith.constant 0 : index
    %19 = vector.load %arg12[%c0_28, %c0_29] : memref<1x32xf32, #tpu.memory_space<vmem>>, vector<1x32xf32>
    %c0_30 = arith.constant 0 : index
    %c0_31 = arith.constant 0 : index
    %20 = vector.load %arg13[%c0_30, %c0_31] : memref<1x32xf32, #tpu.memory_space<vmem>>, vector<1x32xf32>
    %21 = vector.broadcast %17 : vector<1x4xf32> to vector<16x4xf32>
    %22 = arith.mulf %3, %21 : vector<16x4xf32>
    %cst = arith.constant dense<0.000000e+00> : vector<16xf32>
    %23 = vector.multi_reduction <add>, %22, %cst [1] : vector<16x4xf32> to vector<16xf32>
    %24 = vector.shape_cast %23 : vector<16xf32> to vector<16x1xf32>
    %25 = vector.broadcast %24 : vector<16x1xf32> to vector<16x8xf32>
    %26 = arith.mulf %25, %14 : vector<16x8xf32>
    %cst_32 = arith.constant dense<0.000000e+00> : vector<8x8xf32>
    %27 = tpu.matmul %13, %26, %cst_32 {dimension_numbers = #tpu.dot_dimension_numbers<[1], [0], [0], [1], [0, 0, 1, 1], [], []>} : vector<8x16xf32>, vector<16x8xf32>, vector<8x8xf32> -> vector<8x8xf32>
    %cst_33 = arith.constant dense<0.000000e+00> : vector<8x32xf32>
    %28 = tpu.matmul %1, %15, %cst_33 {dimension_numbers = #tpu.dot_dimension_numbers<[1], [0], [0], [1], [0, 0, 1, 1], [], []>} : vector<8x4xf32>, vector<4x32xf32>, vector<8x32xf32> -> vector<8x32xf32>
    %29 = arith.mulf %5, %27 : vector<8x8xf32>
    %30 = vector.broadcast %9 : vector<8x1xf32> to vector<8x32xf32>
    %31 = arith.mulf %30, %28 : vector<8x32xf32>
    %cst_34 = arith.constant dense<0.000000e+00> : vector<8x32xf32>
    %32 = tpu.matmul %29, %31, %cst_34 {dimension_numbers = #tpu.dot_dimension_numbers<[1], [0], [0], [1], [0, 0, 1, 1], [], []>} : vector<8x8xf32>, vector<8x32xf32>, vector<8x32xf32> -> vector<8x32xf32>
    %33 = vector.broadcast %9 : vector<8x1xf32> to vector<8x32xf32>
    %34 = arith.mulf %33, %32 : vector<8x32xf32>
    %35 = vector.broadcast %16 : vector<1x32xf32> to vector<8x32xf32>
    %36 = arith.addf %34, %35 : vector<8x32xf32>
    %cst_35 = arith.constant 0.000000e+00 : f32
    %37 = vector.broadcast %cst_35 : f32 to vector<8x32xf32>
    %38 = arith.maximumf %36, %37 : vector<8x32xf32>
    %39 = vector.broadcast %20 : vector<1x32xf32> to vector<8x32xf32>
    %40 = arith.mulf %38, %39 : vector<8x32xf32>
    %cst_36 = arith.constant dense<0.000000e+00> : vector<8xf32>
    %41 = vector.multi_reduction <add>, %40, %cst_36 [1] : vector<8x32xf32> to vector<8xf32>
    %42 = vector.shape_cast %41 : vector<8xf32> to vector<8x1xf32>
    %43 = vector.broadcast %42 : vector<8x1xf32> to vector<8x16xf32>
    %44 = arith.mulf %43, %13 : vector<8x16xf32>
    %cst_37 = arith.constant dense<0.000000e+00> : vector<16x16xf32>
    %45 = tpu.matmul %14, %44, %cst_37 {dimension_numbers = #tpu.dot_dimension_numbers<[1], [0], [0], [1], [0, 0, 1, 1], [], []>} : vector<16x8xf32>, vector<8x16xf32>, vector<16x16xf32> -> vector<16x16xf32>
    %cst_38 = arith.constant dense<0.000000e+00> : vector<16x32xf32>
    %46 = tpu.matmul %3, %18, %cst_38 {dimension_numbers = #tpu.dot_dimension_numbers<[1], [0], [0], [1], [0, 0, 1, 1], [], []>} : vector<16x4xf32>, vector<4x32xf32>, vector<16x32xf32> -> vector<16x32xf32>
    %47 = arith.mulf %7, %45 : vector<16x16xf32>
    %48 = vector.broadcast %11 : vector<16x1xf32> to vector<16x32xf32>
    %49 = arith.mulf %48, %46 : vector<16x32xf32>
    %cst_39 = arith.constant dense<0.000000e+00> : vector<16x32xf32>
    %50 = tpu.matmul %47, %49, %cst_39 {dimension_numbers = #tpu.dot_dimension_numbers<[1], [0], [0], [1], [0, 0, 1, 1], [], []>} : vector<16x16xf32>, vector<16x32xf32>, vector<16x32xf32> -> vector<16x32xf32>
    %51 = vector.broadcast %11 : vector<16x1xf32> to vector<16x32xf32>
    %52 = arith.mulf %51, %50 : vector<16x32xf32>
    %53 = vector.broadcast %19 : vector<1x32xf32> to vector<16x32xf32>
    %54 = arith.addf %52, %53 : vector<16x32xf32>
    %cst_40 = arith.constant 0.000000e+00 : f32
    %55 = vector.broadcast %cst_40 : f32 to vector<16x32xf32>
    %56 = arith.maximumf %54, %55 : vector<16x32xf32>
    %c0_41 = arith.constant 0 : index
    %c0_42 = arith.constant 0 : index
    %57 = vector.load %arg14[%c0_41, %c0_42] : memref<32x32xf32, #tpu.memory_space<vmem>>, vector<32x32xf32>
    %c0_43 = arith.constant 0 : index
    %c0_44 = arith.constant 0 : index
    %58 = vector.load %arg15[%c0_43, %c0_44] : memref<1x32xf32, #tpu.memory_space<vmem>>, vector<1x32xf32>
    %c0_45 = arith.constant 0 : index
    %c0_46 = arith.constant 0 : index
    %59 = vector.load %arg16[%c0_45, %c0_46] : memref<1x32xf32, #tpu.memory_space<vmem>>, vector<1x32xf32>
    %60 = vector.broadcast %59 : vector<1x32xf32> to vector<16x32xf32>
    %61 = arith.mulf %56, %60 : vector<16x32xf32>
    %cst_47 = arith.constant dense<0.000000e+00> : vector<16xf32>
    %62 = vector.multi_reduction <add>, %61, %cst_47 [1] : vector<16x32xf32> to vector<16xf32>
    %63 = vector.shape_cast %62 : vector<16xf32> to vector<16x1xf32>
    %64 = vector.broadcast %63 : vector<16x1xf32> to vector<16x8xf32>
    %65 = arith.mulf %64, %14 : vector<16x8xf32>
    %cst_48 = arith.constant dense<0.000000e+00> : vector<8x8xf32>
    %66 = tpu.matmul %13, %65, %cst_48 {dimension_numbers = #tpu.dot_dimension_numbers<[1], [0], [0], [1], [0, 0, 1, 1], [], []>} : vector<8x16xf32>, vector<16x8xf32>, vector<8x8xf32> -> vector<8x8xf32>
    %cst_49 = arith.constant dense<0.000000e+00> : vector<8x32xf32>
    %67 = tpu.matmul %38, %57, %cst_49 {dimension_numbers = #tpu.dot_dimension_numbers<[1], [0], [0], [1], [0, 0, 1, 1], [], []>} : vector<8x32xf32>, vector<32x32xf32>, vector<8x32xf32> -> vector<8x32xf32>
    %68 = arith.mulf %5, %66 : vector<8x8xf32>
    %69 = vector.broadcast %9 : vector<8x1xf32> to vector<8x32xf32>
    %70 = arith.mulf %69, %67 : vector<8x32xf32>
    %cst_50 = arith.constant dense<0.000000e+00> : vector<8x32xf32>
    %71 = tpu.matmul %68, %70, %cst_50 {dimension_numbers = #tpu.dot_dimension_numbers<[1], [0], [0], [1], [0, 0, 1, 1], [], []>} : vector<8x8xf32>, vector<8x32xf32>, vector<8x32xf32> -> vector<8x32xf32>
    %72 = vector.broadcast %9 : vector<8x1xf32> to vector<8x32xf32>
    %73 = arith.mulf %72, %71 : vector<8x32xf32>
    %74 = vector.broadcast %58 : vector<1x32xf32> to vector<8x32xf32>
    %75 = arith.addf %73, %74 : vector<8x32xf32>
    %cst_51 = arith.constant 0.000000e+00 : f32
    %76 = vector.broadcast %cst_51 : f32 to vector<8x32xf32>
    %77 = arith.maximumf %75, %76 : vector<8x32xf32>
    %c0_52 = arith.constant 0 : index
    %c0_53 = arith.constant 0 : index
    %78 = vector.load %arg20[%c0_52, %c0_53] : memref<32x32xf32, #tpu.memory_space<vmem>>, vector<32x32xf32>
    %cst_54 = arith.constant dense<0.000000e+00> : vector<8x32xf32>
    %79 = tpu.matmul %77, %78, %cst_54 {dimension_numbers = #tpu.dot_dimension_numbers<[1], [0], [0], [1], [0, 0, 1, 1], [], []>} : vector<8x32xf32>, vector<32x32xf32>, vector<8x32xf32> -> vector<8x32xf32>
    %c0_55 = arith.constant 0 : index
    %c0_56 = arith.constant 0 : index
    %80 = vector.load %arg21[%c0_55, %c0_56] : memref<1x32xf32, #tpu.memory_space<vmem>>, vector<1x32xf32>
    %81 = vector.broadcast %80 : vector<1x32xf32> to vector<8x32xf32>
    %82 = arith.addf %79, %81 : vector<8x32xf32>
    %cst_57 = arith.constant 0.000000e+00 : f32
    %83 = vector.broadcast %cst_57 : f32 to vector<8x32xf32>
    %84 = arith.maximumf %82, %83 : vector<8x32xf32>
    %c0_58 = arith.constant 0 : index
    %c0_59 = arith.constant 0 : index
    %85 = vector.load %arg22[%c0_58, %c0_59] : memref<1x32xf32, #tpu.memory_space<vmem>>, vector<1x32xf32>
    %86 = vector.broadcast %85 : vector<1x32xf32> to vector<8x32xf32>
    %87 = arith.mulf %84, %86 : vector<8x32xf32>
    %cst_60 = arith.constant dense<0.000000e+00> : vector<8xf32>
    %88 = vector.multi_reduction <add>, %87, %cst_60 [1] : vector<8x32xf32> to vector<8xf32>
    %89 = vector.shape_cast %88 : vector<8xf32> to vector<8x1xf32>
    %c0_61 = arith.constant 0 : index
    %c0_62 = arith.constant 0 : index
    %90 = vector.load %arg23[%c0_61, %c0_62] : memref<1x1xf32, #tpu.memory_space<vmem>>, vector<1x1xf32>
    %91 = vector.broadcast %90 : vector<1x1xf32> to vector<8x1xf32>
    %92 = arith.addf %89, %91 : vector<8x1xf32>
    %cst_63 = arith.constant dense<0xFF800000> : vector<1xf32>
    %93 = vector.multi_reduction <maximumf>, %92, %cst_63 [0] : vector<8x1xf32> to vector<1xf32>
    %94 = vector.shape_cast %93 : vector<1xf32> to vector<1x1xf32>
    %95 = vector.broadcast %94 : vector<1x1xf32> to vector<8x1xf32>
    %96 = arith.subf %92, %95 : vector<8x1xf32>
    %97 = math.exp %96 : vector<8x1xf32>
    %cst_64 = arith.constant dense<0.000000e+00> : vector<1xf32>
    %98 = vector.multi_reduction <add>, %97, %cst_64 [0] : vector<8x1xf32> to vector<1xf32>
    %99 = vector.shape_cast %98 : vector<1xf32> to vector<1x1xf32>
    %100 = vector.broadcast %99 : vector<1x1xf32> to vector<8x1xf32>
    %101 = arith.divf %97, %100 : vector<8x1xf32>
    %c0_65 = arith.constant 0 : index
    %c0_66 = arith.constant 0 : index
    %c0_67 = arith.constant 0 : index
    %102 = vector.load %arg24[%c0_65, %c0_66, %c0_67] : memref<1x8x1xf32, #tpu.memory_space<vmem>>, vector<1x8x1xf32>
    %103 = vector.shape_cast %102 : vector<1x8x1xf32> to vector<8x1xf32>
    %104 = vector.shape_cast %101 : vector<8x1xf32> to vector<1x8x1xf32>
    tpu.vector_store %arg24[%c0_65, %c0_66, %c0_67], %104 {strides = array<i32>} : memref<1x8x1xf32, #tpu.memory_space<vmem>>, vector<1x8x1xf32>,
    return
  }
  func.func @transform_0(%arg0: i32) -> (i32, i32, i32) {
    %c0_i32 = arith.constant 0 : i32
    %c0_i32_0 = arith.constant 0 : i32
    %c0_i32_1 = arith.constant 0 : i32
    return %arg0, %c0_i32, %c0_i32_0 : i32, i32, i32
  }
  func.func @transform_1(%arg0: i32) -> (i32, i32, i32) {
    %c0_i32 = arith.constant 0 : i32
    %c0_i32_0 = arith.constant 0 : i32
    %c0_i32_1 = arith.constant 0 : i32
    return %arg0, %c0_i32, %c0_i32_0 : i32, i32, i32
  }
  func.func @transform_2(%arg0: i32) -> (i32, i32, i32) {
    %c0_i32 = arith.constant 0 : i32
    %c0_i32_0 = arith.constant 0 : i32
    %c0_i32_1 = arith.constant 0 : i32
    return %arg0, %c0_i32, %c0_i32_0 : i32, i32, i32
  }
  func.func @transform_3(%arg0: i32) -> (i32, i32, i32) {
    %c0_i32 = arith.constant 0 : i32
    %c0_i32_0 = arith.constant 0 : i32
    %c0_i32_1 = arith.constant 0 : i32
    return %arg0, %c0_i32, %c0_i32_0 : i32, i32, i32
  }
  func.func @transform_4(%arg0: i32) -> (i32, i32, i32) {
    %c0_i32 = arith.constant 0 : i32
    %c0_i32_0 = arith.constant 0 : i32
    %c0_i32_1 = arith.constant 0 : i32
    return %arg0, %c0_i32, %c0_i32_0 : i32, i32, i32
  }
  func.func @transform_5(%arg0: i32) -> (i32, i32, i32) {
    %c0_i32 = arith.constant 0 : i32
    %c0_i32_0 = arith.constant 0 : i32
    %c0_i32_1 = arith.constant 0 : i32
    return %arg0, %c0_i32, %c0_i32_0 : i32, i32, i32
  }
  func.func @transform_6(%arg0: i32) -> (i32, i32, i32) {
    %c0_i32 = arith.constant 0 : i32
    %c0_i32_0 = arith.constant 0 : i32
    %c0_i32_1 = arith.constant 0 : i32
    return %arg0, %c0_i32, %c0_i32_0 : i32, i32, i32
  }
  func.func @transform_7(%arg0: i32) -> (i32, i32) {
    %c0_i32 = arith.constant 0 : i32
    %c0_i32_0 = arith.constant 0 : i32
    %c0_i32_1 = arith.constant 0 : i32
    return %c0_i32, %c0_i32_0 : i32, i32
  }
  func.func @transform_8(%arg0: i32) -> (i32, i32) {
    %c0_i32 = arith.constant 0 : i32
    %c0_i32_0 = arith.constant 0 : i32
    %c0_i32_1 = arith.constant 0 : i32
    return %c0_i32, %c0_i32_0 : i32, i32
  }
  func.func @transform_9(%arg0: i32) -> (i32, i32) {
    %c0_i32 = arith.constant 0 : i32
    %c0_i32_0 = arith.constant 0 : i32
    %c0_i32_1 = arith.constant 0 : i32
    return %c0_i32, %c0_i32_0 : i32, i32
  }
  func.func @transform_10(%arg0: i32) -> (i32, i32) {
    %c0_i32 = arith.constant 0 : i32
    %c0_i32_0 = arith.constant 0 : i32
    %c0_i32_1 = arith.constant 0 : i32
    return %c0_i32, %c0_i32_0 : i32, i32
  }
  func.func @transform_11(%arg0: i32) -> (i32, i32) {
    %c0_i32 = arith.constant 0 : i32
    %c0_i32_0 = arith.constant 0 : i32
    %c0_i32_1 = arith.constant 0 : i32
    return %c0_i32, %c0_i32_0 : i32, i32
  }
  func.func @transform_12(%arg0: i32) -> (i32, i32) {
    %c0_i32 = arith.constant 0 : i32
    %c0_i32_0 = arith.constant 0 : i32
    %c0_i32_1 = arith.constant 0 : i32
    return %c0_i32, %c0_i32_0 : i32, i32
  }
  func.func @transform_13(%arg0: i32) -> (i32, i32) {
    %c0_i32 = arith.constant 0 : i32
    %c0_i32_0 = arith.constant 0 : i32
    %c0_i32_1 = arith.constant 0 : i32
    return %c0_i32, %c0_i32_0 : i32, i32
  }
  func.func @transform_14(%arg0: i32) -> (i32, i32) {
    %c0_i32 = arith.constant 0 : i32
    %c0_i32_0 = arith.constant 0 : i32
    %c0_i32_1 = arith.constant 0 : i32
    return %c0_i32, %c0_i32_0 : i32, i32
  }
  func.func @transform_15(%arg0: i32) -> (i32, i32) {
    %c0_i32 = arith.constant 0 : i32
    %c0_i32_0 = arith.constant 0 : i32
    %c0_i32_1 = arith.constant 0 : i32
    return %c0_i32, %c0_i32_0 : i32, i32
  }
  func.func @transform_16(%arg0: i32) -> (i32, i32) {
    %c0_i32 = arith.constant 0 : i32
    %c0_i32_0 = arith.constant 0 : i32
    %c0_i32_1 = arith.constant 0 : i32
    return %c0_i32, %c0_i32_0 : i32, i32
  }
  func.func @transform_17(%arg0: i32) -> (i32, i32) {
    %c0_i32 = arith.constant 0 : i32
    %c0_i32_0 = arith.constant 0 : i32
    %c0_i32_1 = arith.constant 0 : i32
    return %c0_i32, %c0_i32_0 : i32, i32
  }
  func.func @transform_18(%arg0: i32) -> (i32, i32) {
    %c0_i32 = arith.constant 0 : i32
    %c0_i32_0 = arith.constant 0 : i32
    %c0_i32_1 = arith.constant 0 : i32
    return %c0_i32, %c0_i32_0 : i32, i32
  }
  func.func @transform_19(%arg0: i32) -> (i32, i32) {
    %c0_i32 = arith.constant 0 : i32
    %c0_i32_0 = arith.constant 0 : i32
    %c0_i32_1 = arith.constant 0 : i32
    return %c0_i32, %c0_i32_0 : i32, i32
  }
  func.func @transform_20(%arg0: i32) -> (i32, i32) {
    %c0_i32 = arith.constant 0 : i32
    %c0_i32_0 = arith.constant 0 : i32
    %c0_i32_1 = arith.constant 0 : i32
    return %c0_i32, %c0_i32_0 : i32, i32
  }
  func.func @transform_21(%arg0: i32) -> (i32, i32) {
    %c0_i32 = arith.constant 0 : i32
    %c0_i32_0 = arith.constant 0 : i32
    %c0_i32_1 = arith.constant 0 : i32
    return %c0_i32, %c0_i32_0 : i32, i32
  }
  func.func @transform_22(%arg0: i32) -> (i32, i32) {
    %c0_i32 = arith.constant 0 : i32
    %c0_i32_0 = arith.constant 0 : i32
    %c0_i32_1 = arith.constant 0 : i32
    return %c0_i32, %c0_i32_0 : i32, i32
  }
  func.func @transform_23(%arg0: i32) -> (i32, i32, i32) {
    %c0_i32 = arith.constant 0 : i32
    %c0_i32_0 = arith.constant 0 : i32
    %c0_i32_1 = arith.constant 0 : i32
    return %arg0, %c0_i32, %c0_i32_0 : i32, i32, i32
  }
}

</mosaic_0001>

<bundles_post_ra>
// kernel: actor_network_gcn_forward.1
= control target key start
LH: loop header
LB: loop body
LE: loop exit
PB: predicated region body
PF: predicated region fallthrough
CT: control target
= control target key end

     0   :  { %s2228_s18 = smov 0   ;;  %s2407_s0 = inlined_call_operand.vmem [shape: f32[2,8,4], index: 0, kind: input, shape index: {}]   ;;  %s2408_s1 = inlined_call_operand.vmem [shape: f32[2,16,4], index: 1, kind: input, shape index: {}]   ;;  %s2409_s2 = inlined_call_operand.vmem [shape: f32[2,8,8], index: 2, kind: input, shape index: {}]   ;;  %s2410_s3 = inlined_call_operand.vmem [shape: f32[2,16,16], index: 3, kind: input, shape index: {}]   ;;  %s2411_s4 = inlined_call_operand.vmem [shape: f32[2,8,1], index: 4, kind: input, shape index: {}]   ;;  %s2412_s5 = inlined_call_operand.vmem [shape: f32[2,16,1], index: 5, kind: input, shape index: {}]   ;;  %s2413_s6 = inlined_call_operand.vmem [shape: f32[2,8,16], index: 6, kind: input, shape index: {}]   ;;  %s2414_s7 = inlined_call_operand.vmem [shape: f32[4,32], index: 7, kind: input, shape index: {}]   ;;  %s2415_s8 = inlined_call_operand.vmem [shape: f32[1,32], index: 8, kind: input, shape index: {}]   ;;  %s2416_s9 = inlined_call_operand.vmem [shape: f32[1,4], index: 9, kind: input, shape index: {}]   ;;  %s2417_s10 = inlined_call_operand.vmem [shape: f32[4,32], index: 10, kind: input, shape index: {}]   ;;  %s2418_s11 = inlined_call_operand.vmem [shape: f32[1,32], index: 11, kind: input, shape index: {}]   ;;  %s2419_s12 = inlined_call_operand.vmem [shape: f32[1,32], index: 12, kind: input, shape index: {}]   ;;  %s2420_s13 = inlined_call_operand.vmem [shape: f32[32,32], index: 13, kind: input, shape index: {}]   ;;  %s2421_s14 = inlined_call_operand.vmem [shape: f32[1,32], index: 14, kind: input, shape index: {}]   ;;  %s2422_s15 = inlined_call_operand.vmem [shape: f32[1,32], index: 15, kind: input, shape index: {}]   ;;  %s2423_s16 = inlined_call_operand.vmem [shape: f32[32,32], index: 16, kind: input, shape index: {}]   ;;  %s2424_s17 = inlined_call_operand.vmem [shape: f32[1,32], index: 17, kind: input, shape index: {}]   ;;  %s2425_s18 = inlined_call_operand.vmem [shape: f32[1,32], index: 18, kind: input, shape index: {}]   ;;  %s2426_s19 = inlined_call_operand.vmem [shape: f32[32,32], index: 19, kind: input, shape index: {}]   ;;  %s2427_s20 = inlined_call_operand.vmem [shape: f32[1,32], index: 20, kind: input, shape index: {}]   ;;  %s2428_s21 = inlined_call_operand.vmem [shape: f32[1,32], index: 21, kind: input, shape index: {}]   ;;  %s2429_s22 = inlined_call_operand.<no memory space> [shape: f32[1,1], index: 22, kind: input, shape index: {}]   ;;  %s2430_s23 = inlined_call_operand.vmem [shape: f32[2,8,1], index: 23, kind: output, shape index: {}]  }
   0x1   :  { %2431 = sst [smem:[#allocation3_spill]] %s2407_s0  ;;  %v28_v0 = vstv %s2429_s22 }
   0x2   :  { %2432 = sst [smem:[#allocation4_spill]] %s2408_s1  ;;  %29 = vst [vmem:[#allocation2] sm:$0x1] %v28_v0 }
   0x3   :  { %2433 = sst [smem:[#allocation5_spill]] %s2409_s2 }
   0x4   :  { %2434 = sst [smem:[#allocation6_spill]] %s2410_s3 }
   0x5   :  { %2435 = sst [smem:[#allocation7_spill]] %s2411_s4 }
   0x6   :  { %2436 = sst [smem:[#allocation8_spill]] %s2412_s5 }
   0x7   :  { %2437 = sst [smem:[#allocation9_spill]] %s2413_s6 }
   0x8   :  { %2438 = sst [smem:[#allocation10_spill]] %s2414_s7 }
   0x9 LB: > { %s1908_s4 = sadd.s32 4294967295, %s2099_s18   ;;  %p1912_p0 = scmp.ge.s32.totalorder %s2099_s18, 1  ;;  %s2099_s18 = sphi %s2228_s18, %s35_s18  }
   0xa   : > { %p695_p1 = scmp.lt.s32.totalorder %s2099_s18, 3 }
   0xc   : > { %p696_p2 = pnand %p1912_p0, %p695_p1 }
   0xd   : > { %p784_p3 = scmp.lt.s32.totalorder (!%p696_p2), %s1908_s4, 1  ;;  %v1924_v1 = vld [vmem:[%s2416_s9] ss:$0 sm:$0xff] (!%p696_p2)  ;;  %s2439_s26 = sld [smem:[#allocation4_spill]] (!%p696_p2)  ;;  %vm875_vm0 = vcmask (!%p696_p2), 31744   ;;  %v2101_v9 = vmov (!%p696_p2), 0.0|0.0  }
   0xe   : > { %699 = sbr.rel (%p696_p2) target bundleno = 2204 (0x89c), region = 112  ;;  %s2440_s7 = sld [smem:[#allocation9_spill]] (!%p696_p2)  ;;  %2053 = vmatprep.subr.bf16.mxu0 (!%p696_p2), %v2101_v9  ;;  %vm2102_vm1 = vmmov (!%p696_p2), 0   ;;  %v2103_v10 = vmov (!%p696_p2), 0.0   ;;  %v2104_v11 = vmov (!%p696_p2), 0   ;;  %vm884_vm2 = vcmask (!%p696_p2), 130048  }
   0xf   : > { %1989 = vmatprep.mubr.msk.f32.mxu0 (!%p696_p2), %vm2102_vm1, %v2103_v10  ;;  %1997 = vmatprep.subr.mxu1 (!%p696_p2), %v2103_v10  ;;  %s2441_s16 = sld [smem:[#allocation7_spill]] (!%p696_p2)  ;;  %s2442_s22 = sld [smem:[#allocation8_spill]] (!%p696_p2)  ;;  %vm961_vm3 = vcmask (!%p696_p2), 1043456   ;;  %vm1042_vm4 = vcmask (!%p696_p2), 64512   ;;  %v864_v30 = vld [vmem:[%s2417_s10] sm:$0xf] (!%p696_p2) }
  0x10   : > { %1999 = vmatprep.mubr.msk.f32.mxu1 (!%p696_p2), %vm2102_vm1, %v2103_v10  ;;  %2088 = vset.pattern.permute.xlu0 (!%p696_p2), %v2104_v11  ;;  %s2444_s27 = sld [smem:[#allocation3_spill]] (!%p696_p2)  ;;  %s2445_s3 = sld [smem:[#allocation5_spill]] (!%p696_p2)  ;;  %v1929_v32 = vld [vmem:[%s2415_s8] ss:$0 sm:$0xff] (!%p696_p2)  ;;  %vm1132_vm5 = vcmask (!%p696_p2), 261120   ;;  %v1410_v53 = vld [vmem:[%s2420_s13 + $0x8] sm:$0xff] (!%p696_p2) }
  0x11   : > { %v1930_v38 = vld [vmem:[%s2419_s12] ss:$0 sm:$0xff] (!%p696_p2)  ;;  %v1411_v60 = vld [vmem:[%s2420_s13 + $0x10] sm:$0xff] (!%p696_p2)  ;;  %v1412_v61 = vld [vmem:[%s2420_s13 + $0x18] sm:$0xff] (!%p696_p2)  ;;  %vm1762_vm6 = vcmask (!%p696_p2), 7168  }
  0x12   : > { %v1409_v52 = vld [vmem:[%s2420_s13] sm:$0xff] (!%p696_p2)  ;;  %v2067_v62 = vpack.c.bf16 (!%p696_p2), %v1412_v61, %v1411_v60 }
  0x13   : > { %v2064_v58 = vpack.c.bf16 (!%p696_p2), %v1410_v53, %v1409_v52  ;;  %v1938_v63 = vld [vmem:[%s2418_s11] ss:$0 sm:$0xff] (!%p696_p2) }
  0x15   : > { %s2448_s4 = smov (!%p784_p3, %s1908_s4), 1 }
  0x16   : > { %s2236_s30 = sshll.u32 %s2448_s4, 4  ;;  %s2241_s25 = sshll.u32 %s2448_s4, 3 }
  0x17   : > { %s792_s2 = scalar_lea.vmem %s2439_s26, %s2236_s30  ;;  %s814_s28 = scalar_lea.vmem %s2440_s7, %s2241_s25 }
  0x18   : > { %v820_v2 = vld [vmem:[%s792_s2] sm:$0xff]  ;;  %v821_v3 = vld [vmem:[%s792_s2 + $0x8] sm:$0xff]  ;;  %s805_s0 = scalar_lea.vmem %s2441_s16, %s2241_s25  ;;  %s2270_s24 = scalar_lea.vmem %s2442_s22, %s2236_s30 }
  0x19   : > { %v2251_v4 = vld [vmem:[%s814_s28] sm:$0xff]  ;;  %v873_v5 = vmul.f32 %v1924_v1, %v820_v2  ;;  %v874_v6 = vmul.f32 %v1924_v1, %v821_v3  ;;  %v827_v13 = vld [vmem:[%s2270_s24 + $0x8] sm:$0xff]  ;;  %s2443_s26 = sld [smem:[#allocation10_spill]]  ;;  %s787_s7 = scalar_lea.vmem %s2444_s27, %s2241_s25 }
  0x1a   : > { %829 = vxpose.xlu1.b32.start.end [1/1] (short) (narrow) %v2251_v4, 16  ;;  %v825_v12 = vld [vmem:[%s805_s0] sm:$0xff]  ;;  %s796_s16 = scalar_lea.vmem %s2445_s3, %s2241_s25  ;;  %s2446_s2 = sld [smem:[#allocation6_spill]] }
  0x1b   : > { %v876_v7 = vsel %vm875_vm0, %v873_v5, 0.0  ;;  %v879_v8 = vsel %vm875_vm0, %v874_v6, 0.0  ;;  %v819_v22 = vld [vmem:[%s787_s7] sm:$0xff]  ;;  %s818_s5 = scalar_lea.vmem %s2430_s23, %s2241_s25 }
  0x1c   : > { %877 = vadd.xlane.f32.xlu0 %v876_v7  ;;  %v2299_v25 = vld [vmem:[%s796_s16] sm:$0xff] }
  0x1d   : > { %v826_v42 = vld [vmem:[%s2270_s24] sm:$0xff] }
  0x1e   : > { %v1939_v7 = vld [vmem:[%s2422_s15] ss:$0 sm:$0xff] }
  0x1f   : > { %v861_v21 = vld [vmem:[%s2443_s26] sm:$0xf] }
  0x20   : > { %880 = vadd.xlane.f32.xlu0 %v879_v8  ;;  %s801_s6 = scalar_lea.vmem %s2446_s2, %s2236_s30 }
  0x21   : > { %v823_v51 = vld [vmem:[%s801_s6] sm:$0xff]  ;;  %v824_v54 = vld [vmem:[%s801_s6 + $0x8] sm:$0xff] }
  0x38   : > { %2087 = vset.pattern.permute.xlu1 %v2104_v11 }
  0x3c   : > { %1038 = vperm.xlu1 %2087, %v825_v12  }
  0x40   : > { %1311 = vperm.xlu1 %2087, %v827_v13  }
  0x9a   : > { %v2273_v14 = vpop.trf.xlu1 }
  0x9e   : > { %v2275_v16 = vpop.trf.xlu1 }
  0xa9   : > { %v878_v15 = vpop.xlane.xlu0 %877 }
  0xaa   : > { %v882_v18 = vmul.f32 %v878_v15, %v2273_v14 }
  0xad   : > { %v881_v17 = vpop.xlane.xlu0 %880 }
  0xae   : > { %v883_v19 = vmul.f32 %v881_v17, %v2275_v16 }
  0xb0   : > { %v2054_v20 = vpack.c.bf16 %v883_v19, %v882_v18 }
  0xb2   : > { %2055 = vmatpush3.bf16.msra.mxu0 %v2054_v20 }
  0xb3   : > { %1992 = vmatprep.subr.mxu0 %v2103_v10 }
  0xb5   : > { %1990 = vmatmul.mubr.msk.f32.vlgmr.msra.gmra.mrb[0].mxu0 %vm884_vm2, %v2251_v4 }
  0xb6   : > { %1993 = vmatpush3.msk.msra.mxu0 %vm961_vm3, %v861_v21  ;;  %1994 = vmatprep.mubr.msk.f32.mxu0 %vm2102_vm1, %v2103_v10 }
  0xb9   : > { %1995 = vmatmul.mubr.msk.f32.vlgmr.msra.gmra.mrb[2].mxu0 %vm875_vm0, %v819_v22 }
  0xba   : > { %2004 = vmatprep.mubr.msk.f32.mxu0 %vm1042_vm4, %v2273_v14 }
  0xbb   : > { %v2301_v26 = vpop.permute.xlu1 %1038 }
  0xbf   : > { %v1312_v46 = vpop.permute.xlu1 %1311 }
 0x188   : > { %v954_v23 = vpop.f32.mrb[0].mxu0 }
 0x189   : > { %v1991_v24 = vpop.f32.mrb[1].mxu0  ;;  %v1035_v31 = vmul.f32 %v954_v23, %v2299_v25 }
 0x18c   : > { %v1031_v27 = vpop.f32.mrb[2].mxu0 }
 0x18d   : > { %v1041_v28 = vmul.f32 %v2301_v26, %v1031_v27  ;;  %v1996_v29 = vpop.f32.mrb[3].mxu0 }
 0x18f   : > { %1998 = vmatpush3.msra.mxu1 %v1041_v28 }
 0x190   : > { %2000 = vmatmul.mubr.msk.f32.vlgmr.msra.gmra.mrb[0].mxu1 %vm1042_vm4, %v1035_v31  ;;  %2007 = vmatprep.subr.msk.mxu1 %vm961_vm3, %v864_v30 }
 0x191   : > { %2008 = vmatpush3.msk.msra.mxu1 %vm961_vm3, %v864_v30  ;;  %2009 = vmatprep.mubr.msk.f32.mxu1 %vm875_vm0, %v820_v2 }
 0x192   : > { %2060 = vmatprep.subr.bf16.mxu1 %v2101_v9 }
 0x194   : > { %2010 = vmatmul.mubr.msk.f32.vlgmr.msra.gmra.mrb[2].mxu1 %vm875_vm0, %v821_v3 }
 0x195   : > { %2023 = vmatprep.mubr.msk.f32.mxu1 %vm2102_vm1, %v2103_v10 }
 0x263   : > { %v1112_v33 = vpop.f32.mrb[0].mxu1 }
 0x264   : > { %v1116_v34 = vmul.f32 %v1112_v33, %v2301_v26  ;;  %v2001_v35 = vpop.f32.mrb[1].mxu1 }
 0x266   : > { %v1123_v36 = vadd.f32 %v1929_v32, %v1116_v34  ;;  %v1943_v32 = vld [vmem:[%s2421_s14] ss:$0 sm:$0xff] }
 0x267   : > { %v2011_v37 = vpop.f32.mrb[2].mxu1 }
 0x268   : > { %v1124_v39 = vmax.f32 %v1123_v36, 0.0  ;;  %v1293_v43 = vpop.f32.mrb[3].mxu1  ;;  %v1315_v48 = vmul.f32 %v2011_v37, %v1312_v46  ;;  %v1944_v37 = vld [vmem:[%s2427_s20] ss:$0 sm:$0xff] }
 0x26a   : > { %v1131_v40 = vmul.f32 %v1930_v38, %v1124_v39 }
 0x26c   : > { %v1133_v41 = vsel %vm1132_vm5, %v1131_v40, 0.0 }
 0x26d   : > { %1134 = vadd.xlane.f32.xlu0 %v1133_v41  ;;  %v1946_v41 = vld [vmem:[%s2428_s21] ss:$0 sm:$0xff] }
 0x283   : > { %1306 = vperm.xlu0 %2088, %v826_v42  }
 0x2fa   : > { %v1135_v44 = vpop.xlane.xlu0 %1134 }
 0x2fb   : > { %v1136_v45 = vmul.f32 %v1135_v44, %v2251_v4  ;;  %v1947_v44 = vld [vmem:[#allocation2] ss:$0 sm:$0xff] }
 0x2fd   : > { %2002 = vmatprep.subr.mxu0 %v1136_v45 }
 0x2fe   : > { %2003 = vmatpush3.msra.mxu0 %v1136_v45 }
 0x2ff   : > { %2005 = vmatmul.mubr.msk.f32.vlgmr.msra.gmra.mrb[4].mxu0 %vm1042_vm4, %v2275_v16 }
 0x302   : > { %v1307_v47 = vpop.permute.xlu0 %1306 }
 0x303   : > { %v1314_v49 = vmul.f32 %v1307_v47, %v1293_v43 }
 0x305   : > { %v2056_v50 = vpack.c.bf16 %v1315_v48, %v1314_v49 }
 0x307   : > { %2057 = vmatprep.subr.bf16.mxu0 %v2056_v50 }
 0x308   : > { %2059 = vmatpush3.bf16.msra.mxu0 %v2056_v50 }
 0x309   : > { %2063 = vmatprep.subr.bf16.mxu0 %v2101_v9 }
 0x3d2   : > { %v2006_v55 = vpop.f32.mrb[4].mxu0 }
 0x3d3   : > { %v1209_v56 = vpop.f32.mrb[5].mxu0  ;;  %v1303_v59 = vmul.f32 %v2006_v55, %v824_v54 }
 0x3d4   : > { %v1302_v57 = vmul.f32 %v1209_v56, %v823_v51 }
 0x3d6   : > { %2016 = vmatprep.mubr.msk.f32.mxu0 %vm884_vm2, %v1302_v57 }
 0x3d7   : > { %2017 = vmatmul.mubr.msk.f32.vlgmr.msra.gmra.mrb[6].mxu0 %vm884_vm2, %v1303_v59 }
 0x3d8   : > { %2065 = vmatpush3.bf16.msra.mxu0 %v2064_v58  ;;  %2034 = vmatprep.mubr.msk.f32.mxu0 %vm2102_vm1, %v2103_v10 }
 0x3d9   : > { %2066 = vmatprep.subr.bf16.mxu0 %v2101_v9 }
 0x3dc   : > { %2068 = vmatpush3.bf16.msra.mxu0 %v2067_v62 }
 0x3df   : > { %2035 = vmatmul.mubr.msk.f32.vlgmr.msra.gmra.mrb[8].mxu0 %vm1132_vm5, %v1124_v39 }
 0x4aa   : > { %v2018_v0 = vpop.f32.mrb[6].mxu0 }
 0x4ab   : > { %v1398_v1 = vmul.f32 %v2018_v0, %v1312_v46  ;;  %v1388_v2 = vpop.f32.mrb[7].mxu0 }
 0x4ac   : > { %v1397_v3 = vmul.f32 %v1388_v2, %v1307_v47 }
 0x4ad   : > { %v1406_v5 = vadd.f32 %v1938_v63, %v1398_v1 }
 0x4ae   : > { %v1405_v6 = vadd.f32 %v1938_v63, %v1397_v3 }
 0x4af   : > { %v1408_v8 = vmax.f32 %v1406_v5, 0.0 }
 0x4b0   : > { %v1407_v11 = vmax.f32 %v1405_v6, 0.0 }
 0x4b1   : > { %v1422_v12 = vmul.f32 %v1939_v7, %v1408_v8 }
 0x4b2   : > { %v1570_v13 = vpop.f32.mrb[8].mxu0  ;;  %v1421_v15 = vmul.f32 %v1939_v7, %v1407_v11 }
 0x4b3   : > { %v2036_v17 = vpop.f32.mrb[9].mxu0  ;;  %v1426_v18 = vsel %vm1132_vm5, %v1422_v12, 0.0  ;;  %v1575_v27 = vmul.f32 %v1570_v13, %v2301_v26 }
 0x4b4   : > { %1427 = vadd.xlane.f32.xlu0 %v1426_v18  ;;  %v1423_v19 = vsel %vm1132_vm5, %v1421_v15, 0.0 }
 0x4b5   : > { %1424 = vadd.xlane.f32.xlu1 %v1423_v19 }
 0x541   : > { %v1428_v20 = vpop.xlane.xlu0 %1427 }
 0x542   : > { %v1430_v21 = vmul.f32 %v1428_v20, %v2275_v16  ;;  %v1425_v22 = vpop.xlane.xlu1 %1424 }
 0x543   : > { %v1429_v23 = vmul.f32 %v1425_v22, %v2273_v14  ;;  %v1658_v14 = vld [vmem:[%s2426_s19] sm:$0xff] }
 0x545   : > { %v2061_v24 = vpack.c.bf16 %v1430_v21, %v1429_v23 }
 0x547   : > { %2062 = vmatpush3.bf16.msra.mxu1 %v2061_v24 }
 0x548   : > { %2037 = vmatprep.subr.mxu1 %v2103_v10 }
 0x54a   : > { %2024 = vmatmul.mubr.msk.f32.vlgmr.msra.gmra.mrb[4].mxu1 %vm884_vm2, %v2251_v4  ;;  %v1659_v4 = vld [vmem:[%s2426_s19 + $0x8] sm:$0xff] }
 0x54b   : > { %2038 = vmatpush3.msra.mxu1 %v1575_v27  ;;  %2039 = vmatprep.mubr.msk.f32.mxu1 %vm2102_vm1, %v2103_v10  ;;  %v2070_v30 = vpack.c.bf16 %v1659_v4, %v1658_v14 }
 0x54c   : > { %2069 = vmatprep.subr.bf16.mxu1 %v2101_v9 }
 0x61d   : > { %v1497_v28 = vpop.f32.mrb[4].mxu1 }
 0x61e   : > { %v1574_v16 = vmul.f32 %v1497_v28, %v2299_v25  ;;  %v2025_v29 = vpop.f32.mrb[5].mxu1  ;;  %v1660_v25 = vld [vmem:[%s2426_s19 + $0x10] sm:$0xff] }
 0x620   : > { %2040 = vmatmul.mubr.msk.f32.vlgmr.msra.gmra.mrb[6].mxu1 %vm1042_vm4, %v1574_v16 }
 0x621   : > { %2050 = vmatprep.mubr.msk.f32.mxu1 %vm2102_vm1, %v2103_v10  ;;  %2071 = vmatpush3.bf16.msra.mxu1 %v2070_v30  ;;  %v1661_v10 = vld [vmem:[%s2426_s19 + $0x18] sm:$0xff] }
 0x622   : > { %2072 = vmatprep.subr.bf16.mxu1 %v2101_v9  ;;  %v2073_v31 = vpack.c.bf16 %v1661_v10, %v1660_v25 }
 0x625   : > { %2074 = vmatpush3.bf16.msra.mxu1 %v2073_v31 }
 0x6f3   : > { %v1645_v33 = vpop.f32.mrb[6].mxu1 }
 0x6f4   : > { %v1649_v34 = vmul.f32 %v1645_v33, %v2301_v26  ;;  %v2041_v35 = vpop.f32.mrb[7].mxu1 }
 0x6f6   : > { %v1656_v36 = vadd.f32 %v1943_v32, %v1649_v34 }
 0x6f8   : > { %v1657_v9 = vmax.f32 %v1656_v36, 0.0 }
 0x6fa   : > { %2051 = vmatmul.mubr.msk.f32.vlgmr.msra.gmra.mrb[8].mxu1 %vm1132_vm5, %v1657_v9 }
 0x7cd   : > { %v1738_v38 = vpop.f32.mrb[8].mxu1 }
 0x7ce   : > { %v1739_v39 = vadd.f32 %v1944_v37, %v1738_v38  ;;  %v2052_v40 = vpop.f32.mrb[9].mxu1 }
 0x7d0   : > { %v1742_v42 = vmax.f32 %v1739_v39, 0.0 }
 0x7d2   : > { %v1750_v43 = vmul.f32 %v1946_v41, %v1742_v42 }
 0x7d4   : > { %v1751_v26 = vsel %vm1132_vm5, %v1750_v43, 0.0 }
 0x7d5   : > { %1752 = vadd.xlane.f32.xlu1 %v1751_v26 }
 0x862   : > { %v1753_v45 = vpop.xlane.xlu1 %1752 }
 0x863   : > { %v1761_v46 = vadd.f32 %v1947_v44, %v1753_v45 }
 0x865   : > { %v1763_v47 = vsel %vm1762_vm6, %v1761_v46, -inf }
 0x866   : > { %v1764_v48 = vrot.slane %v1763_v47, 4 }
 0x868   : > { %v1765_v49 = vmax.f32 %v1763_v47, %v1764_v48 }
 0x86a   : > { %v1766_v50 = vrot.slane %v1765_v49, 2 }
 0x86c   : > { %v1767_v51 = vmax.f32 %v1765_v49, %v1766_v50 }
 0x86e   : > { %v1768_v52 = vrot.slane %v1767_v51, 1 }
 0x870   : > { %v1769_v53 = vmax.f32 %v1767_v51, %v1768_v52 }
 0x872   : > { %v1770_v54 = vsub.f32 %v1761_v46, %v1769_v53 }
 0x874   : > { %v1771_v55 = vmul.f32 1.442695, %v1770_v54 }
 0x876   : > { %2089 = vpow2.f32 %v1771_v55 }
 0x880   : > { %v2090_v56 = vpop.eup %2089 }
 0x881   : > { %v1773_v57 = vsel %vm1762_vm6, %v2090_v56, 0.0 }
 0x882   : > { %v1774_v58 = vrot.slane %v1773_v57, 4 }
 0x884   : > { %v1775_v59 = vadd.f32 %v1774_v58, %v1773_v57 }
 0x886   : > { %v1776_v60 = vrot.slane %v1775_v59, 2 }
 0x888   : > { %v1777_v61 = vadd.f32 %v1776_v60, %v1775_v59 }
 0x88a   : > { %v1778_v62 = vrot.slane %v1777_v61, 1 }
 0x88c   : > { %v1779_v63 = vadd.f32 %v1778_v62, %v1777_v61 }
 0x88e   : > { %2091 = vrcp.f32 %v1779_v63 }
 0x898   : > { %v2092_v0 = vpop.eup %2091 }
 0x899   : > { %v1781_v1 = vmul.f32 %v2092_v0, %v2090_v56 }
 0x89b   : > { %1782 = vst.msk [vmem:[%s818_s5] sm:$0xff] %vm1762_vm6, %v1781_v1 }
 0x89c PF: > { %s35_s18 = sadd.s32 1, %s2099_s18  }
 0x89d   : > { %p32_p4 = scmp.ge.s32.totalorder %s35_s18, 4  }
 0x89f   :  { %34 = sbr.rel (!%p32_p4) target bundleno = 9 (0x9), region = 160 }

</bundles_post_ra>
